<compile_context>
chip_gen: v6e
topology: v6e:2x2x1
jax: 0.10.0
libtpu: 0.0.40
codegen_flags: <defaults>
</compile_context>

<pallas_src>
import functools

import jax
import jax.numpy as jnp
from jax.experimental import pallas as pl
from jax.experimental.pallas import tpu as pltpu

# PyTorch SELU constants.
_SELU_ALPHA = 1.6732632423543772848170429916717
_SELU_LAMBDA = 1.0507009873554804934193349852946


def _conv_bn_selu_kernel(x_ref, w_ref, b_ref, o_ref, *, kh, kw, wp, tm):
    # x_ref: (1, Cp, tm + halo) bf16  padded input window, flattened spatial on lanes
    # w_ref: (kh*kw, OC, Cp)    bf16  per-tap weights with BN scale folded in
    # b_ref: (OC, 1)            f32   folded BN bias
    # o_ref: (OC, tm)           f32   lane-dense output tile
    oc = o_ref.shape[0]
    xwin = x_ref[0]                                  # (Cp, tm + halo), loaded once
    acc = jnp.zeros((oc, tm), dtype=jnp.float32)
    for t in range(kh * kw):                         # static, unrolled
        ki, kj = t // kw, t % kw
        off = ki * wp + kj                           # static Python int
        x_t = xwin[:, off:off + tm]                  # (Cp, tm) shifted tap slice
        acc += jnp.dot(w_ref[t], x_t, preferred_element_type=jnp.float32)

    z = acc + b_ref[...]                             # per-channel bias, lane-broadcast

    # expm1(z) with a cubic Taylor blend near 0 to avoid exp(z)-1 cancellation
    # (uses only ops with guaranteed Mosaic lowerings; epilogue stays f32).
    em1 = jnp.exp(z) - 1.0
    em1 = jnp.where(z > -0.01, z * (1.0 + z * (0.5 + z * (1.0 / 6.0))), em1)

    y = _SELU_LAMBDA * jnp.where(z > 0.0, z, _SELU_ALPHA * em1)
    o_ref[...] = y.astype(o_ref.dtype)


def _round_up(x, m):
    return ((x + m - 1) // m) * m


@functools.partial(jax.jit, static_argnames=("kernel_size", "stride"))
def conv2d_batch_selu(x, weight, gamma, beta, running_mean, running_var,
                      *, kernel_size, stride, eps=1e-5):
    n, c, h, w = x.shape
    oc = weight.shape[0]
    kh = kw = int(kernel_size)
    s = int(stride)
    p = int(kernel_size / 2)                         # same formula as the PyTorch module
    hp, wp = h + 2 * p, w + 2 * p
    ho = (h + 2 * p - kh) // s + 1
    wo = (w + 2 * p - kw) // s + 1

    # ---- fold BatchNorm (eval stats) into the weight and a per-channel bias ----
    scale = gamma / jnp.sqrt(running_var + eps)                       # (OC,)
    bias = (beta - running_mean * scale).astype(jnp.float32)          # (OC,)
    w_folded = weight.astype(jnp.float32) * scale[:, None, None, None]

    cp = _round_up(c, 8)                                              # pad contraction dim
    w_taps = jnp.transpose(w_folded, (2, 3, 0, 1)).reshape(kh * kw, oc, c)
    w_taps = jnp.pad(w_taps, ((0, 0), (0, 0), (0, cp - c))).astype(jnp.bfloat16)
    bias2 = bias.reshape(oc, 1)

    # ---- flatten the padded input: channels on sublanes, N*Hp*Wp on lanes ----
    xp = jnp.pad(x, ((0, 0), (0, 0), (p, p), (p, p)))                 # (N, C, Hp, Wp)
    lw = n * hp * wp
    xcf = jnp.transpose(xp, (1, 0, 2, 3)).reshape(c, lw)              # (C, Lw)

    tm = min(2048, _round_up(lw, 128))               # large, lane-dense M tile
    ntiles = int(pl.cdiv(lw, tm))
    off_max = (kh - 1) * wp + (kw - 1)
    halo = _round_up(max(off_max, 1), 128)
    ltot = ntiles * tm + halo
    xcf = jnp.pad(xcf, ((0, cp - c), (0, ltot - lw)))                 # (Cp, Ltot)
    # overlapping per-tile windows (tile + halo) -> plain Blocked BlockSpecs,
    # all in-kernel slices are static.
    xw = jnp.stack([xcf[:, i * tm:i * tm + tm + halo] for i in range(ntiles)],
                   axis=0).astype(jnp.bfloat16)                       # (ntiles, Cp, tm+halo)

    kernel = functools.partial(_conv_bn_selu_kernel, kh=kh, kw=kw, wp=wp, tm=tm)

    flops = 2 * kh * kw * oc * cp * ntiles * tm
    bytes_accessed = xw.size * 2 + w_taps.size * 2 + bias2.size * 4 + oc * ntiles * tm * 4
    cost = pl.CostEstimate(flops=flops,
                           transcendentals=oc * ntiles * tm,
                           bytes_accessed=bytes_accessed)

    out_flat = pl.pallas_call(
        kernel,
        out_shape=jax.ShapeDtypeStruct((oc, ntiles * tm), jnp.float32),
        grid_spec=pltpu.PrefetchScalarGridSpec(
            num_scalar_prefetch=0,
            grid=(ntiles,),
            in_specs=[
                pl.BlockSpec((1, cp, tm + halo), lambda i: (i, 0, 0)),
                pl.BlockSpec((kh * kw, oc, cp), lambda i: (0, 0, 0)),
                pl.BlockSpec((oc, 1), lambda i: (0, 0)),
            ],
            out_specs=pl.BlockSpec((oc, tm), lambda i: (0, i)),
        ),
        compiler_params=pltpu.CompilerParams(
            dimension_semantics=("parallel",),
            vmem_limit_bytes=32 * 1024 * 1024),
        cost_estimate=cost,
    )(xw, w_taps, bias2)

    # crop the dense (stride-1) flat result back to (N, OC, Ho, Wo) at the requested stride
    yd = out_flat[:, :lw].reshape(oc, n, hp, wp)
    y = yd[:, :, 0:(ho - 1) * s + 1:s, 0:(wo - 1) * s + 1:s]
    return jnp.transpose(y, (1, 0, 2, 3))


def _reference(x, weight, gamma, beta, running_mean, running_var,
               *, kernel_size, stride, eps=1e-5):
    p = int(kernel_size / 2)
    scale = gamma / jnp.sqrt(running_var + eps)
    bias = (beta - running_mean * scale).reshape(1, -1, 1, 1)
    # quantize operands the same way the kernel does (bf16 MXU inputs, f32 accumulate)
    wq = (weight.astype(jnp.float32) * scale[:, None, None, None]
          ).astype(jnp.bfloat16).astype(jnp.float32)
    xq = x.astype(jnp.bfloat16).astype(jnp.float32)
    z = jax.lax.conv_general_dilated(
        xq, wq, window_strides=(stride, stride),
        padding=[(p, p), (p, p)],
        dimension_numbers=("NCHW", "OIHW", "NCHW")) + bias
    return _SELU_LAMBDA * jnp.where(z > 0, z, _SELU_ALPHA * jnp.expm1(z))


if __name__ == "__main__":
    in_channels, out_channels, kernel_size, stride = 4, 8, 3, 1
    N, H, W = 2, 16, 16

    key = jax.random.PRNGKey(0)
    kx, kw_, kg, kb, km, kv = jax.random.split(key, 6)

    x = jax.random.normal(kx, (N, in_channels, H, W), dtype=jnp.float32)
    weight = 0.1 * jax.random.normal(
        kw_, (out_channels, in_channels, kernel_size, kernel_size), dtype=jnp.float32)
    gamma = 1.0 + 0.1 * jax.random.normal(kg, (out_channels,), dtype=jnp.float32)
    beta = 0.1 * jax.random.normal(kb, (out_channels,), dtype=jnp.float32)
    running_mean = 0.1 * jax.random.normal(km, (out_channels,), dtype=jnp.float32)
    running_var = jnp.abs(jax.random.normal(kv, (out_channels,), dtype=jnp.float32)) + 0.5

    y = conv2d_batch_selu(x, weight, gamma, beta, running_mean, running_var,
                          kernel_size=kernel_size, stride=stride)
    y = jax.block_until_ready(y)

    y_ref = _reference(x, weight, gamma, beta, running_mean, running_var,
                       kernel_size=kernel_size, stride=stride)
    assert y.shape == (N, out_channels, H, W)
    err = jnp.max(jnp.abs(y - y_ref))
    assert jnp.allclose(y, y_ref, rtol=1e-3, atol=1e-4), f"mismatch vs reference, max abs err={err}"

    print("KERNEL_OK")
</pallas_src>

<mosaic_0001>
module attributes {stable_mosaic.version = 11 : i64} {
  func.func @_conv_bn_selu_kernel(%arg0: i32, %arg1: memref<1x8x896xbf16, #tpu.memory_space<vmem>>, %arg2: memref<9x8x8xbf16, #tpu.memory_space<vmem>>, %arg3: memref<8x1xf32, #tpu.memory_space<vmem>>, %arg4: memref<8x768xf32, #tpu.memory_space<vmem>>) attributes {dimension_semantics = [#tpu.dimension_semantics<parallel>], iteration_bounds = array<i64: 1>, scalar_prefetch = 0 : i64, scratch_operands = 0 : i64, tpu.core_type = #tpu.core_type<tc>, window_params = [{transform_indices = @transform_0, window_bounds = array<i64: 1, 8, 896>}, {pipeline_mode = #tpu.pipeline_mode<synchronous>, transform_indices = @transform_1, window_bounds = array<i64: 9, 8, 8>}, {pipeline_mode = #tpu.pipeline_mode<synchronous>, transform_indices = @transform_2, window_bounds = array<i64: 8, 1>}, {transform_indices = @transform_3, window_bounds = array<i64: 8, 768>}]} {
    %c0 = arith.constant 0 : index
    %c0_0 = arith.constant 0 : index
    %c0_1 = arith.constant 0 : index
    %0 = vector.load %arg1[%c0, %c0_0, %c0_1] : memref<1x8x896xbf16, #tpu.memory_space<vmem>>, vector<1x8x896xbf16>
    %1 = vector.shape_cast %0 : vector<1x8x896xbf16> to vector<8x896xbf16>
    %cst = arith.constant 0.000000e+00 : f32
    %2 = vector.broadcast %cst : f32 to vector<8x768xf32>
    %3 = vector.extract_strided_slice %1 {offsets = [0, 0], sizes = [8, 768], strides = [1, 1]} : vector<8x896xbf16> to vector<8x768xbf16>
    %c0_2 = arith.constant 0 : index
    %c0_3 = arith.constant 0 : index
    %c0_4 = arith.constant 0 : index
    %4 = vector.load %arg2[%c0_2, %c0_3, %c0_4] : memref<9x8x8xbf16, #tpu.memory_space<vmem>>, vector<1x8x8xbf16>
    %5 = vector.shape_cast %4 : vector<1x8x8xbf16> to vector<8x8xbf16>
    %cst_5 = arith.constant dense<0.000000e+00> : vector<8x768xf32>
    %6 = tpu.matmul %5, %3, %cst_5 {dimension_numbers = #tpu.dot_dimension_numbers<[1], [0], [0], [1], [0, 0, 1, 1], [], []>} : vector<8x8xbf16>, vector<8x768xbf16>, vector<8x768xf32> -> vector<8x768xf32>
    %7 = arith.addf %2, %6 : vector<8x768xf32>
    %8 = vector.extract_strided_slice %1 {offsets = [0, 1], sizes = [8, 768], strides = [1, 1]} : vector<8x896xbf16> to vector<8x768xbf16>
    %c1 = arith.constant 1 : index
    %c0_6 = arith.constant 0 : index
    %c0_7 = arith.constant 0 : index
    %9 = vector.load %arg2[%c1, %c0_6, %c0_7] : memref<9x8x8xbf16, #tpu.memory_space<vmem>>, vector<1x8x8xbf16>
    %10 = vector.shape_cast %9 : vector<1x8x8xbf16> to vector<8x8xbf16>
    %cst_8 = arith.constant dense<0.000000e+00> : vector<8x768xf32>
    %11 = tpu.matmul %10, %8, %cst_8 {dimension_numbers = #tpu.dot_dimension_numbers<[1], [0], [0], [1], [0, 0, 1, 1], [], []>} : vector<8x8xbf16>, vector<8x768xbf16>, vector<8x768xf32> -> vector<8x768xf32>
    %12 = arith.addf %7, %11 : vector<8x768xf32>
    %13 = vector.extract_strided_slice %1 {offsets = [0, 2], sizes = [8, 768], strides = [1, 1]} : vector<8x896xbf16> to vector<8x768xbf16>
    %c2 = arith.constant 2 : index
    %c0_9 = arith.constant 0 : index
    %c0_10 = arith.constant 0 : index
    %14 = vector.load %arg2[%c2, %c0_9, %c0_10] : memref<9x8x8xbf16, #tpu.memory_space<vmem>>, vector<1x8x8xbf16>
    %15 = vector.shape_cast %14 : vector<1x8x8xbf16> to vector<8x8xbf16>
    %cst_11 = arith.constant dense<0.000000e+00> : vector<8x768xf32>
    %16 = tpu.matmul %15, %13, %cst_11 {dimension_numbers = #tpu.dot_dimension_numbers<[1], [0], [0], [1], [0, 0, 1, 1], [], []>} : vector<8x8xbf16>, vector<8x768xbf16>, vector<8x768xf32> -> vector<8x768xf32>
    %17 = arith.addf %12, %16 : vector<8x768xf32>
    %18 = vector.extract_strided_slice %1 {offsets = [0, 18], sizes = [8, 768], strides = [1, 1]} : vector<8x896xbf16> to vector<8x768xbf16>
    %c3 = arith.constant 3 : index
    %c0_12 = arith.constant 0 : index
    %c0_13 = arith.constant 0 : index
    %19 = vector.load %arg2[%c3, %c0_12, %c0_13] : memref<9x8x8xbf16, #tpu.memory_space<vmem>>, vector<1x8x8xbf16>
    %20 = vector.shape_cast %19 : vector<1x8x8xbf16> to vector<8x8xbf16>
    %cst_14 = arith.constant dense<0.000000e+00> : vector<8x768xf32>
    %21 = tpu.matmul %20, %18, %cst_14 {dimension_numbers = #tpu.dot_dimension_numbers<[1], [0], [0], [1], [0, 0, 1, 1], [], []>} : vector<8x8xbf16>, vector<8x768xbf16>, vector<8x768xf32> -> vector<8x768xf32>
    %22 = arith.addf %17, %21 : vector<8x768xf32>
    %23 = vector.extract_strided_slice %1 {offsets = [0, 19], sizes = [8, 768], strides = [1, 1]} : vector<8x896xbf16> to vector<8x768xbf16>
    %c4 = arith.constant 4 : index
    %c0_15 = arith.constant 0 : index
    %c0_16 = arith.constant 0 : index
    %24 = vector.load %arg2[%c4, %c0_15, %c0_16] : memref<9x8x8xbf16, #tpu.memory_space<vmem>>, vector<1x8x8xbf16>
    %25 = vector.shape_cast %24 : vector<1x8x8xbf16> to vector<8x8xbf16>
    %cst_17 = arith.constant dense<0.000000e+00> : vector<8x768xf32>
    %26 = tpu.matmul %25, %23, %cst_17 {dimension_numbers = #tpu.dot_dimension_numbers<[1], [0], [0], [1], [0, 0, 1, 1], [], []>} : vector<8x8xbf16>, vector<8x768xbf16>, vector<8x768xf32> -> vector<8x768xf32>
    %27 = arith.addf %22, %26 : vector<8x768xf32>
    %28 = vector.extract_strided_slice %1 {offsets = [0, 20], sizes = [8, 768], strides = [1, 1]} : vector<8x896xbf16> to vector<8x768xbf16>
    %c5 = arith.constant 5 : index
    %c0_18 = arith.constant 0 : index
    %c0_19 = arith.constant 0 : index
    %29 = vector.load %arg2[%c5, %c0_18, %c0_19] : memref<9x8x8xbf16, #tpu.memory_space<vmem>>, vector<1x8x8xbf16>
    %30 = vector.shape_cast %29 : vector<1x8x8xbf16> to vector<8x8xbf16>
    %cst_20 = arith.constant dense<0.000000e+00> : vector<8x768xf32>
    %31 = tpu.matmul %30, %28, %cst_20 {dimension_numbers = #tpu.dot_dimension_numbers<[1], [0], [0], [1], [0, 0, 1, 1], [], []>} : vector<8x8xbf16>, vector<8x768xbf16>, vector<8x768xf32> -> vector<8x768xf32>
    %32 = arith.addf %27, %31 : vector<8x768xf32>
    %33 = vector.extract_strided_slice %1 {offsets = [0, 36], sizes = [8, 768], strides = [1, 1]} : vector<8x896xbf16> to vector<8x768xbf16>
    %c6 = arith.constant 6 : index
    %c0_21 = arith.constant 0 : index
    %c0_22 = arith.constant 0 : index
    %34 = vector.load %arg2[%c6, %c0_21, %c0_22] : memref<9x8x8xbf16, #tpu.memory_space<vmem>>, vector<1x8x8xbf16>
    %35 = vector.shape_cast %34 : vector<1x8x8xbf16> to vector<8x8xbf16>
    %cst_23 = arith.constant dense<0.000000e+00> : vector<8x768xf32>
    %36 = tpu.matmul %35, %33, %cst_23 {dimension_numbers = #tpu.dot_dimension_numbers<[1], [0], [0], [1], [0, 0, 1, 1], [], []>} : vector<8x8xbf16>, vector<8x768xbf16>, vector<8x768xf32> -> vector<8x768xf32>
    %37 = arith.addf %32, %36 : vector<8x768xf32>
    %38 = vector.extract_strided_slice %1 {offsets = [0, 37], sizes = [8, 768], strides = [1, 1]} : vector<8x896xbf16> to vector<8x768xbf16>
    %c7 = arith.constant 7 : index
    %c0_24 = arith.constant 0 : index
    %c0_25 = arith.constant 0 : index
    %39 = vector.load %arg2[%c7, %c0_24, %c0_25] : memref<9x8x8xbf16, #tpu.memory_space<vmem>>, vector<1x8x8xbf16>
    %40 = vector.shape_cast %39 : vector<1x8x8xbf16> to vector<8x8xbf16>
    %cst_26 = arith.constant dense<0.000000e+00> : vector<8x768xf32>
    %41 = tpu.matmul %40, %38, %cst_26 {dimension_numbers = #tpu.dot_dimension_numbers<[1], [0], [0], [1], [0, 0, 1, 1], [], []>} : vector<8x8xbf16>, vector<8x768xbf16>, vector<8x768xf32> -> vector<8x768xf32>
    %42 = arith.addf %37, %41 : vector<8x768xf32>
    %43 = vector.extract_strided_slice %1 {offsets = [0, 38], sizes = [8, 768], strides = [1, 1]} : vector<8x896xbf16> to vector<8x768xbf16>
    %c8 = arith.constant 8 : index
    %c0_27 = arith.constant 0 : index
    %c0_28 = arith.constant 0 : index
    %44 = vector.load %arg2[%c8, %c0_27, %c0_28] : memref<9x8x8xbf16, #tpu.memory_space<vmem>>, vector<1x8x8xbf16>
    %45 = vector.shape_cast %44 : vector<1x8x8xbf16> to vector<8x8xbf16>
    %cst_29 = arith.constant dense<0.000000e+00> : vector<8x768xf32>
    %46 = tpu.matmul %45, %43, %cst_29 {dimension_numbers = #tpu.dot_dimension_numbers<[1], [0], [0], [1], [0, 0, 1, 1], [], []>} : vector<8x8xbf16>, vector<8x768xbf16>, vector<8x768xf32> -> vector<8x768xf32>
    %47 = arith.addf %42, %46 : vector<8x768xf32>
    %c0_30 = arith.constant 0 : index
    %c0_31 = arith.constant 0 : index
    %48 = vector.load %arg3[%c0_30, %c0_31] : memref<8x1xf32, #tpu.memory_space<vmem>>, vector<8x1xf32>
    %49 = vector.broadcast %48 : vector<8x1xf32> to vector<8x768xf32>
    %50 = arith.addf %47, %49 : vector<8x768xf32>
    %51 = math.exp %50 : vector<8x768xf32>
    %cst_32 = arith.constant 1.000000e+00 : f32
    %52 = vector.broadcast %cst_32 : f32 to vector<8x768xf32>
    %53 = arith.subf %51, %52 : vector<8x768xf32>
    %cst_33 = arith.constant -0.00999999977 : f32
    %54 = vector.broadcast %cst_33 : f32 to vector<8x768xf32>
    %55 = arith.cmpf ogt, %50, %54 : vector<8x768xf32>
    %cst_34 = arith.constant 0.166666672 : f32
    %56 = vector.broadcast %cst_34 : f32 to vector<8x768xf32>
    %57 = arith.mulf %50, %56 : vector<8x768xf32>
    %cst_35 = arith.constant 5.000000e-01 : f32
    %58 = vector.broadcast %cst_35 : f32 to vector<8x768xf32>
    %59 = arith.addf %58, %57 : vector<8x768xf32>
    %60 = arith.mulf %50, %59 : vector<8x768xf32>
    %cst_36 = arith.constant 1.000000e+00 : f32
    %61 = vector.broadcast %cst_36 : f32 to vector<8x768xf32>
    %62 = arith.addf %61, %60 : vector<8x768xf32>
    %63 = arith.mulf %50, %62 : vector<8x768xf32>
    %64 = arith.select %55, %63, %53 : vector<8x768xi1>, vector<8x768xf32>
    %cst_37 = arith.constant 0.000000e+00 : f32
    %65 = vector.broadcast %cst_37 : f32 to vector<8x768xf32>
    %66 = arith.cmpf ogt, %50, %65 : vector<8x768xf32>
    %cst_38 = arith.constant 1.67326319 : f32
    %67 = vector.broadcast %cst_38 : f32 to vector<8x768xf32>
    %68 = arith.mulf %67, %64 : vector<8x768xf32>
    %69 = arith.select %66, %50, %68 : vector<8x768xi1>, vector<8x768xf32>
    %cst_39 = arith.constant 1.05070102 : f32
    %70 = vector.broadcast %cst_39 : f32 to vector<8x768xf32>
    %71 = arith.mulf %70, %69 : vector<8x768xf32>
    %c0_40 = arith.constant 0 : index
    %c0_41 = arith.constant 0 : index
    %72 = vector.load %arg4[%c0_40, %c0_41] : memref<8x768xf32, #tpu.memory_space<vmem>>, vector<8x768xf32>
    tpu.vector_store %arg4[%c0_40, %c0_41], %71 {strides = array<i32>} : memref<8x768xf32, #tpu.memory_space<vmem>>, vector<8x768xf32>,
    return
  }
  func.func @transform_0(%arg0: i32) -> (i32, i32, i32) {
    %c0_i32 = arith.constant 0 : i32
    %c0_i32_0 = arith.constant 0 : i32
    %c0_i32_1 = arith.constant 0 : i32
    return %arg0, %c0_i32, %c0_i32_0 : i32, i32, i32
  }
  func.func @transform_1(%arg0: i32) -> (i32, i32, i32) {
    %c0_i32 = arith.constant 0 : i32
    %c0_i32_0 = arith.constant 0 : i32
    %c0_i32_1 = arith.constant 0 : i32
    %c0_i32_2 = arith.constant 0 : i32
    return %c0_i32, %c0_i32_0, %c0_i32_1 : i32, i32, i32
  }
  func.func @transform_2(%arg0: i32) -> (i32, i32) {
    %c0_i32 = arith.constant 0 : i32
    %c0_i32_0 = arith.constant 0 : i32
    %c0_i32_1 = arith.constant 0 : i32
    return %c0_i32, %c0_i32_0 : i32, i32
  }
  func.func @transform_3(%arg0: i32) -> (i32, i32) {
    %c0_i32 = arith.constant 0 : i32
    %c0_i32_0 = arith.constant 0 : i32
    return %c0_i32, %arg0 : i32, i32
  }
}

</mosaic_0001>

<bundles_post_ra>
// kernel: conv2d_batch_selu.1
= control target key start
LH: loop header
LB: loop body
LE: loop exit
PB: predicated region body
PF: predicated region fallthrough
CT: control target
= control target key end

     0   :  { %v1772_v2 = vmov 0   ;;  %s1773_s16 = smov 127   ;;  %s1774_s21 = smov 126   ;;  %vm54_vm0 = vcmask 1039360   ;;  %vm65_vm1 = vcmask 1043456   ;;  %vm61_vm2 = vcmask 64512   ;;  %s2194_s0 = inlined_call_operand.vmem [shape: bf16[1,8,896], index: 0, kind: input, shape index: {}]   ;;  %s2195_s2 = inlined_call_operand.vmem [shape: f32[8,1], index: 2, kind: input, shape index: {}]   ;;  %s2196_s1 = inlined_call_operand.vmem [shape: bf16[9,8,8], index: 1, kind: input, shape index: {}]   ;;  %s2197_s3 = inlined_call_operand.vmem [shape: f32[8,768], index: 3, kind: output, shape index: {}]  }
   0x1   :  { %v16_v0 = vld [vmem:[%s2194_s0 + $0x8] sm:$0xff]  ;;  %v15_v1 = vld [vmem:[%s2194_s0] sm:$0xff]  ;;  %116 = vmatprep.mubr.bf16.mxu0 %v1772_v2  ;;  %157 = vmatprep.mubr.bf16.mxu1 %v1772_v2  ;;  %v17_v7 = vld [vmem:[%s2194_s0 + $0x10] sm:$0xff]  ;;  %s1775_s22 = smov 110   ;;  %s1777_s23 = smov 108   ;;  %vm367_vm3 = vcmask 1031168  }
   0x2   :  { %v1809_v3 = vcombine.low %v16_v0, %v16_v0  ;;  %v1811_v4 = vcombine.low %v15_v1, %v15_v1  ;;  %1752 = vset.pattern.permute.xlu0 %v1772_v2  ;;  %v1816_v5 = vcombine.high %v16_v0, %v16_v0  ;;  %v1818_v6 = vcombine.high %v15_v1, %v15_v1  ;;  %v1759_v10 = vld [vmem:[%s2194_s0 + $0x18] ss:$0 sps:$4 sm:$0xff]   ;;  %s1776_s0 = smov 109   ;;  %s1778_s24 = smov 92   ;;  %v1562_v11 = vld [vmem:[%s2195_s2] sm:$0xff] }
   0x3   :  { %v1825_v8 = vcombine.high %v17_v7, %v17_v7  ;;  %v1827_v9 = vcombine.low %v17_v7, %v17_v7  ;;  %s1779_s25 = smov 91   ;;  %s1780_s26 = smov 90   ;;  %v1668_v19 = vld [vmem:[%s2196_s1 + $0x4] sm:$0xf]  ;;  %v19_v35 = vld [vmem:[%s2196_s1] sm:$0xf] }
   0x4   :  { %44 = vrot.lane.b32.xlu1 %v1809_v3, %s1773_s16  ;;  %40 = vrot.lane.b32.xlu0 %v1811_v4, %s1773_s16  ;;  %v211_v28 = vsel %vm65_vm1, %v1811_v4, 0  ;;  %v217_v33 = vsel %vm65_vm1, %v1809_v3, 0  ;;  %v1688_v50 = vld [vmem:[%s2196_s1 + $0x8] sm:$0xf]  ;;  %vm540_vm4 = vcmask 900096   ;;  %vm713_vm5 = vcmask 891904  }
   0x5   :  { %v223_v38 = vsel %vm65_vm1, %v1827_v9, 0  ;;  %vm886_vm6 = vcmask 883712   ;;  %vm1059_vm7 = vcmask 752640   ;;  %vm1232_vm8 = vcmask 744448  }
   0x6   :  { %vm1405_vm9 = vcmask 736256  }
   0x8   :  { %46 = vrot.lane.b32.xlu1 %v1816_v5, %s1773_s16  ;;  %42 = vrot.lane.b32.xlu0 %v1818_v6, %s1773_s16 }
   0xc   :  { %50 = vrot.lane.b32.xlu1 %v1825_v8, %s1773_s16  ;;  %48 = vrot.lane.b32.xlu0 %v1827_v9, %s1773_s16 }
  0x10   :  { %353 = vrot.lane.b32.xlu1 %v1811_v4, %s1774_s21  ;;  %52 = vrot.lane.b32.xlu0 %v1759_v10, %s1773_s16 }
  0x14   :  { %357 = vrot.lane.b32.xlu1 %v1809_v3, %s1774_s21  ;;  %355 = vrot.lane.b32.xlu0 %v1818_v6, %s1774_s21 }
  0x18   :  { %361 = vrot.lane.b32.xlu1 %v1827_v9, %s1774_s21  ;;  %359 = vrot.lane.b32.xlu0 %v1816_v5, %s1774_s21 }
  0x1c   :  { %365 = vrot.lane.b32.xlu1 %v1759_v10, %s1774_s21  ;;  %363 = vrot.lane.b32.xlu0 %v1825_v8, %s1774_s21 }
  0x20   :  { %528 = vrot.lane.b32.xlu1 %v1818_v6, %s1775_s22  ;;  %526 = vrot.lane.b32.xlu0 %v1811_v4, %s1775_s22 }
  0x24   :  { %532 = vrot.lane.b32.xlu1 %v1816_v5, %s1775_s22  ;;  %530 = vrot.lane.b32.xlu0 %v1809_v3, %s1775_s22 }
  0x28   :  { %536 = vrot.lane.b32.xlu1 %v1825_v8, %s1775_s22  ;;  %534 = vrot.lane.b32.xlu0 %v1827_v9, %s1775_s22 }
  0x2c   :  { %699 = vrot.lane.b32.xlu1 %v1811_v4, %s1776_s0  ;;  %538 = vrot.lane.b32.xlu0 %v1759_v10, %s1775_s22 }
  0x30   :  { %703 = vrot.lane.b32.xlu1 %v1809_v3, %s1776_s0  ;;  %701 = vrot.lane.b32.xlu0 %v1818_v6, %s1776_s0 }
  0x34   :  { %707 = vrot.lane.b32.xlu1 %v1827_v9, %s1776_s0  ;;  %705 = vrot.lane.b32.xlu0 %v1816_v5, %s1776_s0 }
  0x38   :  { %711 = vrot.lane.b32.xlu1 %v1759_v10, %s1776_s0  ;;  %709 = vrot.lane.b32.xlu0 %v1825_v8, %s1776_s0 }
  0x3c   :  { %874 = vrot.lane.b32.xlu1 %v1818_v6, %s1777_s23  ;;  %872 = vrot.lane.b32.xlu0 %v1811_v4, %s1777_s23 }
  0x40   :  { %878 = vrot.lane.b32.xlu1 %v1816_v5, %s1777_s23  ;;  %876 = vrot.lane.b32.xlu0 %v1809_v3, %s1777_s23 }
  0x44   :  { %882 = vrot.lane.b32.xlu1 %v1825_v8, %s1777_s23  ;;  %880 = vrot.lane.b32.xlu0 %v1827_v9, %s1777_s23 }
  0x48   :  { %1045 = vrot.lane.b32.xlu1 %v1811_v4, %s1778_s24  ;;  %884 = vrot.lane.b32.xlu0 %v1759_v10, %s1777_s23 }
  0x4c   :  { %1049 = vrot.lane.b32.xlu1 %v1809_v3, %s1778_s24  ;;  %1047 = vrot.lane.b32.xlu0 %v1818_v6, %s1778_s24 }
  0x50   :  { %1053 = vrot.lane.b32.xlu1 %v1827_v9, %s1778_s24  ;;  %1051 = vrot.lane.b32.xlu0 %v1816_v5, %s1778_s24 }
  0x54   :  { %1057 = vrot.lane.b32.xlu1 %v1759_v10, %s1778_s24  ;;  %1055 = vrot.lane.b32.xlu0 %v1825_v8, %s1778_s24 }
  0x58   :  { %1220 = vrot.lane.b32.xlu1 %v1818_v6, %s1779_s25  ;;  %1218 = vrot.lane.b32.xlu0 %v1811_v4, %s1779_s25 }
  0x5c   :  { %1224 = vrot.lane.b32.xlu1 %v1816_v5, %s1779_s25  ;;  %1222 = vrot.lane.b32.xlu0 %v1809_v3, %s1779_s25 }
  0x60   :  { %1228 = vrot.lane.b32.xlu1 %v1825_v8, %s1779_s25  ;;  %1226 = vrot.lane.b32.xlu0 %v1827_v9, %s1779_s25 }
  0x64   :  { %1391 = vrot.lane.b32.xlu1 %v1811_v4, %s1780_s26  ;;  %1230 = vrot.lane.b32.xlu0 %v1759_v10, %s1779_s25 }
  0x68   :  { %1395 = vrot.lane.b32.xlu1 %v1809_v3, %s1780_s26  ;;  %1393 = vrot.lane.b32.xlu0 %v1818_v6, %s1780_s26  ;;  %v1695_v3 = vld [vmem:[%s2196_s1 + $0xc] sm:$0xf] }
  0x6c   :  { %1399 = vrot.lane.b32.xlu1 %v1827_v9, %s1780_s26  ;;  %1397 = vrot.lane.b32.xlu0 %v1816_v5, %s1780_s26 }
  0x70   :  { %1403 = vrot.lane.b32.xlu1 %v1759_v10, %s1780_s26  ;;  %1401 = vrot.lane.b32.xlu0 %v1825_v8, %s1780_s26 }
  0x74   :  { %1565 = vperm.xlu0 %1752, %v1562_v11  }
  0x76   :  { %v45_v12 = vpop.permute.xlu1 %44  ;;  %v41_v13 = vpop.permute.xlu0 %40 }
  0x7a   :  { %v47_v14 = vpop.permute.xlu1 %46  ;;  %v43_v15 = vpop.permute.xlu0 %42 }
  0x7b   :  { %v56_v16 = vsel %vm54_vm0, %v43_v15, %v45_v12  ;;  %v55_v17 = vsel %vm54_vm0, %v41_v13, %v43_v15  ;;  %v57_v20 = vsel %vm54_vm0, %v45_v12, %v47_v14 }
  0x7c   :  { %1676 = vmatprep.subr.msk.bf16.mxu0 %vm65_vm1, %v56_v16  ;;  %v67_v18 = vsel %vm65_vm1, %v55_v17, 0  ;;  %v73_v24 = vsel %vm65_vm1, %v57_v20, 0 }
  0x7d   :  { %99 = vmatpush1.bf16.msra.mxu0 %v67_v18 }
  0x7e   :  { %v51_v21 = vpop.permute.xlu1 %50  ;;  %v49_v22 = vpop.permute.xlu0 %48 }
  0x7f   :  { %v58_v23 = vsel %vm54_vm0, %v47_v14, %v49_v22  ;;  %v59_v25 = vsel %vm54_vm0, %v49_v22, %v51_v21 }
  0x80   :  { %1677 = vmatmul.mubr.msk.bf16.vlgmr.msra.gmra.mxu0 %vm61_vm2, %v1668_v19  ;;  %1678 = vmatprep.subr.msk.bf16.mxu1 %vm65_vm1, %v58_v23  ;;  %v79_v30 = vsel %vm65_vm1, %v59_v25, 0 }
  0x81   :  { %140 = vmatpush1.bf16.msra.mxu1 %v73_v24  ;;  %198 = vmatprep.mubr.bf16.mxu0 %v1772_v2 }
  0x82   :  { %v354_v26 = vpop.permute.xlu1 %353  ;;  %v53_v27 = vpop.permute.xlu0 %52  ;;  %1682 = vmatprep.subr.msk.bf16.mxu1 %vm65_vm1, %v1818_v6 }
  0x83   :  { %v60_v29 = vsel %vm54_vm0, %v51_v21, %v53_v27 }
  0x84   :  { %1679 = vmatmul.mubr.msk.bf16.vlgmr.msra.gmra.mxu1 %vm61_vm2, %v1668_v19  ;;  %1680 = vmatprep.subr.msk.bf16.mxu0 %vm65_vm1, %v60_v29 }
  0x85   :  { %181 = vmatpush1.bf16.msra.mxu0 %v79_v30  ;;  %243 = vmatpush1.bf16.msra.mxu1 %v211_v28 }
  0x86   :  { %v358_v31 = vpop.permute.xlu1 %357  ;;  %v356_v32 = vpop.permute.xlu0 %355  ;;  %1684 = vmatprep.subr.msk.bf16.mxu0 %vm65_vm1, %v1816_v5  ;;  %260 = vmatprep.mubr.bf16.mxu1 %v1772_v2 }
  0x87   :  { %1686 = vmatprep.subr.msk.bf16.mxu1 %vm65_vm1, %v1825_v8  ;;  %v369_v34 = vsel %vm367_vm3, %v356_v32, %v358_v31  ;;  %v368_v40 = vsel %vm367_vm3, %v354_v26, %v356_v32 }
  0x88   :  { %1681 = vmatmul.mubr.msk.bf16.vlgmr.msra.gmra.mxu0 %vm61_vm2, %v1668_v19  ;;  %v378_v44 = vsel %vm65_vm1, %v368_v40, 0  ;;  %v1702_v19 = vld [vmem:[%s2196_s1 + $0x10] sm:$0xf] }
  0x89   :  { %284 = vmatpush1.bf16.msra.mxu0 %v217_v33  ;;  %301 = vmatprep.mubr.bf16.mxu0 %v1772_v2 }
  0x8a   :  { %v362_v36 = vpop.permute.xlu1 %361  ;;  %1689 = vmatprep.subr.msk.bf16.mxu0 %vm65_vm1, %v369_v34  ;;  %v360_v37 = vpop.permute.xlu0 %359  ;;  %v1709_v34 = vld [vmem:[%s2196_s1 + $0x14] sm:$0xf] }
  0x8b   :  { %v371_v39 = vsel %vm367_vm3, %v360_v37, %v362_v36  ;;  %v370_v45 = vsel %vm367_vm3, %v358_v31, %v360_v37 }
  0x8c   :  { %1683 = vmatmul.mubr.msk.bf16.vlgmr.msra.gmra.mxu1 %vm61_vm2, %v19_v35  ;;  %v384_v48 = vsel %vm65_vm1, %v370_v45, 0 }
  0x8d   :  { %325 = vmatpush1.bf16.msra.mxu1 %v223_v38  ;;  %342 = vmatprep.mubr.bf16.mxu1 %v1772_v2 }
  0x8e   :  { %1691 = vmatprep.subr.msk.bf16.mxu1 %vm65_vm1, %v371_v39  ;;  %v366_v41 = vpop.permute.xlu1 %365  ;;  %v364_v42 = vpop.permute.xlu0 %363 }
  0x8f   :  { %v373_v43 = vsel %vm367_vm3, %v364_v42, %v366_v41  ;;  %v372_v49 = vsel %vm367_vm3, %v362_v36, %v364_v42 }
  0x90   :  { %1685 = vmatmul.mubr.msk.bf16.vlgmr.msra.gmra.mxu0 %vm61_vm2, %v19_v35  ;;  %v390_v54 = vsel %vm65_vm1, %v372_v49, 0  ;;  %v1716_v49 = vld [vmem:[%s2196_s1 + $0x18] sm:$0xf] }
  0x91   :  { %410 = vmatpush1.bf16.msra.mxu0 %v378_v44  ;;  %427 = vmatprep.mubr.bf16.mxu0 %v1772_v2 }
  0x92   :  { %1693 = vmatprep.subr.msk.bf16.mxu0 %vm65_vm1, %v373_v43  ;;  %v529_v46 = vpop.permute.xlu1 %528  ;;  %v527_v47 = vpop.permute.xlu0 %526 }
  0x93   :  { %v541_v55 = vsel %vm540_vm4, %v527_v47, %v529_v46 }
  0x94   :  { %1687 = vmatmul.mubr.msk.bf16.vlgmr.msra.gmra.mxu1 %vm61_vm2, %v19_v35  ;;  %v551_v59 = vsel %vm65_vm1, %v541_v55, 0 }
  0x95   :  { %451 = vmatpush1.bf16.msra.mxu1 %v384_v48  ;;  %468 = vmatprep.mubr.bf16.mxu1 %v1772_v2 }
  0x96   :  { %v533_v51 = vpop.permute.xlu1 %532  ;;  %v531_v52 = vpop.permute.xlu0 %530 }
  0x97   :  { %v542_v53 = vsel %vm540_vm4, %v529_v46, %v531_v52  ;;  %v543_v60 = vsel %vm540_vm4, %v531_v52, %v533_v51 }
  0x98   :  { %1690 = vmatmul.mubr.msk.bf16.vlgmr.msra.gmra.mxu0 %vm61_vm2, %v1688_v50  ;;  %1696 = vmatprep.subr.msk.bf16.mxu1 %vm65_vm1, %v542_v53  ;;  %v557_v0 = vsel %vm65_vm1, %v543_v60, 0 }
  0x99   :  { %492 = vmatpush1.bf16.msra.mxu0 %v390_v54  ;;  %509 = vmatprep.mubr.bf16.mxu0 %v1772_v2 }
  0x9a   :  { %v537_v56 = vpop.permute.xlu1 %536  ;;  %v535_v57 = vpop.permute.xlu0 %534 }
  0x9b   :  { %v544_v58 = vsel %vm540_vm4, %v533_v51, %v535_v57  ;;  %v545_v1 = vsel %vm540_vm4, %v535_v57, %v537_v56 }
  0x9c   :  { %1692 = vmatmul.mubr.msk.bf16.vlgmr.msra.gmra.mxu1 %vm61_vm2, %v1688_v50  ;;  %1698 = vmatprep.subr.msk.bf16.mxu0 %vm65_vm1, %v544_v58  ;;  %v563_v7 = vsel %vm65_vm1, %v545_v1, 0 }
  0x9d   :  { %583 = vmatpush1.bf16.msra.mxu1 %v551_v59  ;;  %600 = vmatprep.mubr.bf16.mxu1 %v1772_v2 }
  0x9e   :  { %v700_v61 = vpop.permute.xlu1 %699  ;;  %v539_v62 = vpop.permute.xlu0 %538 }
  0x9f   :  { %v546_v63 = vsel %vm540_vm4, %v537_v56, %v539_v62 }
  0xa0   :  { %1694 = vmatmul.mubr.msk.bf16.vlgmr.msra.gmra.mxu0 %vm61_vm2, %v1688_v50  ;;  %1700 = vmatprep.subr.msk.bf16.mxu1 %vm65_vm1, %v546_v63  ;;  %v1723_v63 = vld [vmem:[%s2196_s1 + $0x1c] sm:$0xf] }
  0xa1   :  { %624 = vmatpush1.bf16.msra.mxu0 %v557_v0  ;;  %641 = vmatprep.mubr.bf16.mxu0 %v1772_v2 }
  0xa2   :  { %v704_v4 = vpop.permute.xlu1 %703  ;;  %v702_v5 = vpop.permute.xlu0 %701 }
  0xa3   :  { %v715_v6 = vsel %vm713_vm5, %v702_v5, %v704_v4  ;;  %v714_v8 = vsel %vm713_vm5, %v700_v61, %v702_v5 }
  0xa4   :  { %1697 = vmatmul.mubr.msk.bf16.vlgmr.msra.gmra.mxu1 %vm61_vm2, %v1695_v3  ;;  %1703 = vmatprep.subr.msk.bf16.mxu0 %vm65_vm1, %v715_v6  ;;  %v724_v12 = vsel %vm65_vm1, %v714_v8, 0 }
  0xa5   :  { %665 = vmatpush1.bf16.msra.mxu1 %v563_v7  ;;  %682 = vmatprep.mubr.bf16.mxu1 %v1772_v2 }
  0xa6   :  { %v708_v9 = vpop.permute.xlu1 %707  ;;  %v706_v10 = vpop.permute.xlu0 %705 }
  0xa7   :  { %v717_v11 = vsel %vm713_vm5, %v706_v10, %v708_v9  ;;  %v716_v13 = vsel %vm713_vm5, %v704_v4, %v706_v10 }
  0xa8   :  { %1699 = vmatmul.mubr.msk.bf16.vlgmr.msra.gmra.mxu0 %vm61_vm2, %v1695_v3  ;;  %1705 = vmatprep.subr.msk.bf16.mxu1 %vm65_vm1, %v717_v11  ;;  %v730_v17 = vsel %vm65_vm1, %v716_v13, 0 }
  0xa9   :  { %756 = vmatpush1.bf16.msra.mxu0 %v724_v12  ;;  %773 = vmatprep.mubr.bf16.mxu0 %v1772_v2 }
  0xaa   :  { %v712_v14 = vpop.permute.xlu1 %711  ;;  %v710_v15 = vpop.permute.xlu0 %709 }
  0xab   :  { %v719_v16 = vsel %vm713_vm5, %v710_v15, %v712_v14  ;;  %v718_v18 = vsel %vm713_vm5, %v708_v9, %v710_v15  ;;  %v1730_v15 = vld [vmem:[%s2196_s1 + $0x20] sm:$0xf] }
  0xac   :  { %1701 = vmatmul.mubr.msk.bf16.vlgmr.msra.gmra.mxu1 %vm61_vm2, %v1695_v3  ;;  %1707 = vmatprep.subr.msk.bf16.mxu0 %vm65_vm1, %v719_v16  ;;  %v736_v22 = vsel %vm65_vm1, %v718_v18, 0 }
  0xad   :  { %797 = vmatpush1.bf16.msra.mxu1 %v730_v17  ;;  %814 = vmatprep.mubr.bf16.mxu1 %v1772_v2 }
  0xae   :  { %v875_v20 = vpop.permute.xlu1 %874  ;;  %v873_v21 = vpop.permute.xlu0 %872 }
  0xaf   :  { %v887_v23 = vsel %vm886_vm6, %v873_v21, %v875_v20 }
  0xb0   :  { %1704 = vmatmul.mubr.msk.bf16.vlgmr.msra.gmra.mxu0 %vm61_vm2, %v1702_v19  ;;  %v897_v27 = vsel %vm65_vm1, %v887_v23, 0 }
  0xb1   :  { %838 = vmatpush1.bf16.msra.mxu0 %v736_v22  ;;  %855 = vmatprep.mubr.bf16.mxu0 %v1772_v2 }
  0xb2   :  { %v879_v24 = vpop.permute.xlu1 %878  ;;  %v877_v25 = vpop.permute.xlu0 %876 }
  0xb3   :  { %v888_v26 = vsel %vm886_vm6, %v875_v20, %v877_v25  ;;  %v889_v28 = vsel %vm886_vm6, %v877_v25, %v879_v24 }
  0xb4   :  { %1706 = vmatmul.mubr.msk.bf16.vlgmr.msra.gmra.mxu1 %vm61_vm2, %v1702_v19  ;;  %1710 = vmatprep.subr.msk.bf16.mxu1 %vm65_vm1, %v888_v26  ;;  %v903_v32 = vsel %vm65_vm1, %v889_v28, 0 }
  0xb5   :  { %929 = vmatpush1.bf16.msra.mxu1 %v897_v27  ;;  %946 = vmatprep.mubr.bf16.mxu1 %v1772_v2 }
  0xb6   :  { %v883_v29 = vpop.permute.xlu1 %882  ;;  %v881_v30 = vpop.permute.xlu0 %880 }
  0xb7   :  { %v890_v31 = vsel %vm886_vm6, %v879_v24, %v881_v30  ;;  %v891_v33 = vsel %vm886_vm6, %v881_v30, %v883_v29 }
  0xb8   :  { %1708 = vmatmul.mubr.msk.bf16.vlgmr.msra.gmra.mxu0 %vm61_vm2, %v1702_v19  ;;  %1712 = vmatprep.subr.msk.bf16.mxu0 %vm65_vm1, %v890_v31  ;;  %v909_v38 = vsel %vm65_vm1, %v891_v33, 0 }
  0xb9   :  { %970 = vmatpush1.bf16.msra.mxu0 %v903_v32  ;;  %987 = vmatprep.mubr.bf16.mxu0 %v1772_v2 }
  0xba   :  { %v1046_v35 = vpop.permute.xlu1 %1045  ;;  %v885_v36 = vpop.permute.xlu0 %884 }
  0xbb   :  { %v892_v37 = vsel %vm886_vm6, %v883_v29, %v885_v36 }
  0xbc   :  { %1711 = vmatmul.mubr.msk.bf16.vlgmr.msra.gmra.mxu1 %vm61_vm2, %v1709_v34  ;;  %1714 = vmatprep.subr.msk.bf16.mxu1 %vm65_vm1, %v892_v37 }
  0xbd   :  { %1011 = vmatpush1.bf16.msra.mxu1 %v909_v38  ;;  %1028 = vmatprep.mubr.bf16.mxu1 %v1772_v2 }
  0xbe   :  { %v1050_v39 = vpop.permute.xlu1 %1049  ;;  %v1048_v40 = vpop.permute.xlu0 %1047 }
  0xbf   :  { %v1060_v41 = vsel %vm1059_vm7, %v1046_v35, %v1048_v40  ;;  %v1061_v42 = vsel %vm1059_vm7, %v1048_v40, %v1050_v39 }
  0xc0   :  { %v1070_v43 = vsel %vm65_vm1, %v1060_v41, 0  ;;  %1713 = vmatmul.mubr.msk.bf16.vlgmr.msra.gmra.mxu0 %vm61_vm2, %v1709_v34  ;;  %1717 = vmatprep.subr.msk.bf16.mxu0 %vm65_vm1, %v1061_v42 }
  0xc1   :  { %1102 = vmatpush1.bf16.msra.mxu0 %v1070_v43  ;;  %1119 = vmatprep.mubr.bf16.mxu0 %v1772_v2 }
  0xc2   :  { %v1054_v44 = vpop.permute.xlu1 %1053  ;;  %v1052_v45 = vpop.permute.xlu0 %1051 }
  0xc3   :  { %v1062_v46 = vsel %vm1059_vm7, %v1050_v39, %v1052_v45  ;;  %v1063_v47 = vsel %vm1059_vm7, %v1052_v45, %v1054_v44 }
  0xc4   :  { %v1076_v48 = vsel %vm65_vm1, %v1062_v46, 0  ;;  %1715 = vmatmul.mubr.msk.bf16.vlgmr.msra.gmra.mxu1 %vm61_vm2, %v1709_v34  ;;  %1719 = vmatprep.subr.msk.bf16.mxu1 %vm65_vm1, %v1063_v47 }
  0xc5   :  { %1143 = vmatpush1.bf16.msra.mxu1 %v1076_v48  ;;  %1160 = vmatprep.mubr.bf16.mxu1 %v1772_v2 }
  0xc6   :  { %v1058_v50 = vpop.permute.xlu1 %1057  ;;  %v1056_v51 = vpop.permute.xlu0 %1055 }
  0xc7   :  { %v1064_v52 = vsel %vm1059_vm7, %v1054_v44, %v1056_v51  ;;  %v1065_v53 = vsel %vm1059_vm7, %v1056_v51, %v1058_v50 }
  0xc8   :  { %v1082_v54 = vsel %vm65_vm1, %v1064_v52, 0  ;;  %1718 = vmatmul.mubr.msk.bf16.vlgmr.msra.gmra.mxu0 %vm61_vm2, %v1716_v49  ;;  %1721 = vmatprep.subr.msk.bf16.mxu0 %vm65_vm1, %v1065_v53 }
  0xc9   :  { %1184 = vmatpush1.bf16.msra.mxu0 %v1082_v54  ;;  %1201 = vmatprep.mubr.bf16.mxu0 %v1772_v2 }
  0xca   :  { %v1221_v55 = vpop.permute.xlu1 %1220  ;;  %v1219_v56 = vpop.permute.xlu0 %1218 }
  0xcb   :  { %v1233_v57 = vsel %vm1232_vm8, %v1219_v56, %v1221_v55 }
  0xcc   :  { %1720 = vmatmul.mubr.msk.bf16.vlgmr.msra.gmra.mxu1 %vm61_vm2, %v1716_v49  ;;  %v1243_v61 = vsel %vm65_vm1, %v1233_v57, 0 }
  0xcd   :  { %1292 = vmatprep.mubr.bf16.mxu1 %v1772_v2 }
  0xce   :  { %v1225_v58 = vpop.permute.xlu1 %1224  ;;  %v1223_v59 = vpop.permute.xlu0 %1222 }
  0xcf   :  { %v1234_v60 = vsel %vm1232_vm8, %v1221_v55, %v1223_v59  ;;  %v1235_v62 = vsel %vm1232_vm8, %v1223_v59, %v1225_v58 }
  0xd0   :  { %1722 = vmatmul.mubr.msk.bf16.vlgmr.msra.gmra.mxu0 %vm61_vm2, %v1716_v49  ;;  %1724 = vmatprep.subr.msk.bf16.mxu1 %vm65_vm1, %v1234_v60  ;;  %v1249_v4 = vsel %vm65_vm1, %v1235_v62, 0 }
  0xd1   :  { %1275 = vmatpush1.bf16.msra.mxu1 %v1243_v61  ;;  %1333 = vmatprep.mubr.bf16.mxu0 %v1772_v2 }
  0xd2   :  { %v1229_v0 = vpop.permute.xlu1 %1228  ;;  %v1227_v1 = vpop.permute.xlu0 %1226 }
  0xd3   :  { %v1236_v3 = vsel %vm1232_vm8, %v1225_v58, %v1227_v1  ;;  %v1237_v5 = vsel %vm1232_vm8, %v1227_v1, %v1229_v0 }
  0xd4   :  { %1725 = vmatmul.mubr.msk.bf16.vlgmr.msra.gmra.mxu1 %vm61_vm2, %v1723_v63  ;;  %1726 = vmatprep.subr.msk.bf16.mxu0 %vm65_vm1, %v1236_v3  ;;  %v1255_v9 = vsel %vm65_vm1, %v1237_v5, 0 }
  0xd5   :  { %1316 = vmatpush1.bf16.msra.mxu0 %v1249_v4  ;;  %1374 = vmatprep.mubr.bf16.mxu1 %v1772_v2 }
  0xd6   :  { %v1392_v6 = vpop.permute.xlu1 %1391  ;;  %v1231_v7 = vpop.permute.xlu0 %1230 }
  0xd7   :  { %v1238_v8 = vsel %vm1232_vm8, %v1229_v0, %v1231_v7 }
  0xd8   :  { %1727 = vmatmul.mubr.msk.bf16.vlgmr.msra.gmra.mxu0 %vm61_vm2, %v1723_v63  ;;  %1728 = vmatprep.subr.msk.bf16.mxu1 %vm65_vm1, %v1238_v8 }
  0xd9   :  { %1357 = vmatpush1.bf16.msra.mxu1 %v1255_v9  ;;  %1465 = vmatprep.mubr.bf16.mxu0 %v1772_v2 }
  0xda   :  { %v1396_v10 = vpop.permute.xlu1 %1395  ;;  %v1394_v11 = vpop.permute.xlu0 %1393 }
  0xdb   :  { %v1406_v12 = vsel %vm1405_vm9, %v1392_v6, %v1394_v11  ;;  %v1407_v13 = vsel %vm1405_vm9, %v1394_v11, %v1396_v10 }
  0xdc   :  { %v1416_v14 = vsel %vm65_vm1, %v1406_v12, 0  ;;  %1729 = vmatmul.mubr.msk.bf16.vlgmr.msra.gmra.mxu1 %vm61_vm2, %v1723_v63  ;;  %1731 = vmatprep.subr.msk.bf16.mxu0 %vm65_vm1, %v1407_v13 }
  0xdd   :  { %1448 = vmatpush1.bf16.msra.mxu0 %v1416_v14  ;;  %1506 = vmatprep.mubr.bf16.mxu1 %v1772_v2 }
  0xde   :  { %v1400_v16 = vpop.permute.xlu1 %1399  ;;  %v1398_v17 = vpop.permute.xlu0 %1397 }
  0xdf   :  { %v1408_v18 = vsel %vm1405_vm9, %v1396_v10, %v1398_v17  ;;  %v1409_v19 = vsel %vm1405_vm9, %v1398_v17, %v1400_v16 }
  0xe0   :  { %v1422_v20 = vsel %vm65_vm1, %v1408_v18, 0  ;;  %1732 = vmatmul.mubr.msk.bf16.vlgmr.msra.gmra.mxu0 %vm61_vm2, %v1730_v15  ;;  %1733 = vmatprep.subr.msk.bf16.mxu1 %vm65_vm1, %v1409_v19 }
  0xe1   :  { %1489 = vmatpush1.bf16.msra.mxu1 %v1422_v20  ;;  %1547 = vmatprep.mubr.bf16.mxu0 %v1772_v2 }
  0xe2   :  { %v1404_v21 = vpop.permute.xlu1 %1403  ;;  %v1402_v22 = vpop.permute.xlu0 %1401 }
  0xe3   :  { %v1410_v23 = vsel %vm1405_vm9, %v1400_v16, %v1402_v22  ;;  %v1411_v24 = vsel %vm1405_vm9, %v1402_v22, %v1404_v21 }
  0xe4   :  { %v1428_v25 = vsel %vm65_vm1, %v1410_v23, 0  ;;  %1734 = vmatmul.mubr.msk.bf16.vlgmr.msra.gmra.mxu1 %vm61_vm2, %v1730_v15  ;;  %1735 = vmatprep.subr.msk.bf16.mxu0 %vm65_vm1, %v1411_v24 }
  0xe5   :  { %1530 = vmatpush1.bf16.msra.mxu0 %v1428_v25 }
  0xe8   :  { %1736 = vmatmul.mubr.msk.bf16.vlgmr.msra.gmra.mxu0 %vm61_vm2, %v1730_v15 }
 0x140   :  { %v118_v26 = vpop.f32.mrf.mxu0 }
 0x142   :  { %v120_v27 = vpop.f32.mrf.mxu0 }
 0x144   :  { %v122_v28 = vpop.f32.mrf.mxu0  ;;  %v159_v29 = vpop.f32.mrf.mxu1 }
 0x146   :  { %v123_v2 = vpop.f32.mrf.mxu0  ;;  %v161_v30 = vpop.f32.mrf.mxu1 }
 0x148   :  { %v163_v31 = vpop.f32.mrf.mxu1  ;;  %v200_v32 = vpop.f32.mrf.mxu0 }
 0x14a   :  { %v164_v33 = vpop.f32.mrf.mxu1  ;;  %v202_v34 = vpop.f32.mrf.mxu0 }
 0x14c   :  { %v204_v35 = vpop.f32.mrf.mxu0  ;;  %v262_v36 = vpop.f32.mrf.mxu1 }
 0x14d   :  { %v2066_v37 = vadd.f32 %v262_v36, %v118_v26 }
 0x14e   :  { %v205_v38 = vpop.f32.mrf.mxu0  ;;  %v264_v39 = vpop.f32.mrf.mxu1 }
 0x14f   :  { %v2068_v40 = vadd.f32 %v264_v39, %v120_v27 }
 0x150   :  { %v266_v41 = vpop.f32.mrf.mxu1  ;;  %v303_v42 = vpop.f32.mrf.mxu0 }
 0x151   :  { %v2070_v43 = vadd.f32 %v303_v42, %v159_v29 }
 0x152   :  { %v267_v44 = vpop.f32.mrf.mxu1  ;;  %v305_v45 = vpop.f32.mrf.mxu0 }
 0x153   :  { %v2072_v46 = vadd.f32 %v305_v45, %v161_v30 }
 0x154   :  { %v307_v47 = vpop.f32.mrf.mxu0  ;;  %v344_v48 = vpop.f32.mrf.mxu1 }
 0x155   :  { %v2074_v49 = vadd.f32 %v344_v48, %v200_v32 }
 0x156   :  { %v308_v50 = vpop.f32.mrf.mxu0  ;;  %v346_v51 = vpop.f32.mrf.mxu1 }
 0x157   :  { %v347_v52 = vadd.f32 %v346_v51, %v202_v34 }
 0x158   :  { %v348_v53 = vpop.f32.mrf.mxu1  ;;  %v429_v54 = vpop.f32.mrf.mxu0 }
 0x15a   :  { %v349_v55 = vpop.f32.mrf.mxu1  ;;  %v2076_v56 = vpop.f32.mrf.mxu0 }
 0x15c   :  { %v433_v57 = vpop.f32.mrf.mxu0  ;;  %v2078_v58 = vpop.f32.mrf.mxu1 }
 0x15e   :  { %v434_v59 = vpop.f32.mrf.mxu0  ;;  %v2080_v60 = vpop.f32.mrf.mxu1 }
 0x160   :  { %v474_v61 = vpop.f32.mrf.mxu1  ;;  %v2082_v62 = vpop.f32.mrf.mxu0 }
 0x161   :  { %v518_v61 = vadd.f32 %v429_v54, %v2066_v37  ;;  %v521_v37 = vadd.f32 %v2080_v60, %v2072_v46 }
 0x162   :  { %v475_v63 = vpop.f32.mrf.mxu1  ;;  %v513_v0 = vpop.f32.mrf.mxu0 }
 0x163   :  { %v2084_v1 = vadd.f32 %v513_v0, %v347_v52 }
 0x164   :  { %v515_v3 = vpop.f32.mrf.mxu0  ;;  %v602_v4 = vpop.f32.mrf.mxu1 }
 0x165   :  { %v519_v3 = vadd.f32 %v2076_v56, %v2068_v40  ;;  %v522_v40 = vadd.f32 %v2082_v62, %v2074_v49 }
 0x166   :  { %v516_v5 = vpop.f32.mrf.mxu0  ;;  %v604_v6 = vpop.f32.mrf.mxu1 }
 0x167   :  { %v691_v5 = vadd.f32 %v602_v4, %v518_v61 }
 0x168   :  { %v606_v7 = vpop.f32.mrf.mxu1  ;;  %v643_v8 = vpop.f32.mrf.mxu0 }
 0x16a   :  { %v607_v9 = vpop.f32.mrf.mxu1  ;;  %v2086_v10 = vpop.f32.mrf.mxu0 }
 0x16c   :  { %v647_v11 = vpop.f32.mrf.mxu0  ;;  %v2088_v12 = vpop.f32.mrf.mxu1 }
 0x16d   :  { %v692_v11 = vadd.f32 %v604_v6, %v519_v3  ;;  %v694_v6 = vadd.f32 %v2086_v10, %v521_v37 }
 0x16e   :  { %v648_v13 = vpop.f32.mrf.mxu0  ;;  %v2090_v14 = vpop.f32.mrf.mxu1 }
 0x16f   :  { %v696_v62 = vadd.f32 %v2090_v14, %v2084_v1 }
 0x170   :  { %v688_v15 = vpop.f32.mrf.mxu1  ;;  %v775_v16 = vpop.f32.mrf.mxu0 }
 0x171   :  { %v864_v13 = vadd.f32 %v775_v16, %v691_v5  ;;  %v520_v15 = vadd.f32 %v2078_v58, %v2070_v43  ;;  %v695_v58 = vadd.f32 %v2088_v12, %v522_v40 }
 0x172   :  { %v689_v17 = vpop.f32.mrf.mxu1  ;;  %v777_v18 = vpop.f32.mrf.mxu0 }
 0x173   :  { %v693_v54 = vadd.f32 %v643_v8, %v520_v15 }
 0x174   :  { %v779_v19 = vpop.f32.mrf.mxu0  ;;  %v816_v20 = vpop.f32.mrf.mxu1 }
 0x175   :  { %v866_v16 = vadd.f32 %v816_v20, %v693_v54 }
 0x176   :  { %v780_v21 = vpop.f32.mrf.mxu0  ;;  %v818_v22 = vpop.f32.mrf.mxu1 }
 0x177   :  { %v865_v21 = vadd.f32 %v777_v18, %v692_v11  ;;  %v867_v46 = vadd.f32 %v818_v22, %v694_v6 }
 0x178   :  { %v820_v23 = vpop.f32.mrf.mxu1  ;;  %v857_v24 = vpop.f32.mrf.mxu0 }
 0x17a   :  { %v821_v25 = vpop.f32.mrf.mxu1  ;;  %v2092_v26 = vpop.f32.mrf.mxu0 }
 0x17b   :  { %v869_v22 = vadd.f32 %v2092_v26, %v696_v62 }
 0x17c   :  { %v861_v27 = vpop.f32.mrf.mxu0  ;;  %v948_v28 = vpop.f32.mrf.mxu1 }
 0x17d   :  { %v1037_v23 = vadd.f32 %v948_v28, %v864_v13 }
 0x17e   :  { %v862_v29 = vpop.f32.mrf.mxu0  ;;  %v950_v2 = vpop.f32.mrf.mxu1 }
 0x17f   :  { %v1038_v56 = vadd.f32 %v950_v2, %v865_v21 }
 0x180   :  { %v952_v30 = vpop.f32.mrf.mxu1  ;;  %v989_v31 = vpop.f32.mrf.mxu0 }
 0x181   :  { %v2109_v30 = vpop.permute.xlu0 %1565  ;;  %v1039_v60 = vadd.f32 %v989_v31, %v866_v16 }
 0x182   :  { %v953_v32 = vpop.f32.mrf.mxu1  ;;  %v991_v33 = vpop.f32.mrf.mxu0 }
 0x183   :  { %v1040_v10 = vadd.f32 %v991_v33, %v867_v46 }
 0x184   :  { %v993_v34 = vpop.f32.mrf.mxu0  ;;  %v1030_v35 = vpop.f32.mrf.mxu1 }
 0x185   :  { %v868_v34 = vadd.f32 %v857_v24, %v695_v58 }
 0x186   :  { %v994_v36 = vpop.f32.mrf.mxu0  ;;  %v2094_v38 = vpop.f32.mrf.mxu1 }
 0x187   :  { %v1042_v33 = vadd.f32 %v2094_v38, %v869_v22 }
 0x188   :  { %v1034_v39 = vpop.f32.mrf.mxu1  ;;  %v1121_v41 = vpop.f32.mrf.mxu0 }
 0x189   :  { %v1210_v4 = vadd.f32 %v1121_v41, %v1037_v23  ;;  %v1041_v41 = vadd.f32 %v1030_v35, %v868_v34 }
 0x18a   :  { %v1035_v42 = vpop.f32.mrf.mxu1  ;;  %v1123_v44 = vpop.f32.mrf.mxu0 }
 0x18b   :  { %v1211_v18 = vadd.f32 %v1123_v44, %v1038_v56 }
 0x18c   :  { %v1125_v45 = vpop.f32.mrf.mxu0  ;;  %v1162_v47 = vpop.f32.mrf.mxu1 }
 0x18d   :  { %v1212_v20 = vadd.f32 %v1162_v47, %v1039_v60 }
 0x18e   :  { %v1126_v48 = vpop.f32.mrf.mxu0  ;;  %v1164_v50 = vpop.f32.mrf.mxu1 }
 0x18f   :  { %v1213_v31 = vadd.f32 %v1164_v50, %v1040_v10 }
 0x190   :  { %v1166_v51 = vpop.f32.mrf.mxu1  ;;  %v1203_v52 = vpop.f32.mrf.mxu0 }
 0x191   :  { %v1214_v48 = vadd.f32 %v1203_v52, %v1041_v41 }
 0x192   :  { %v1167_v53 = vpop.f32.mrf.mxu1  ;;  %v2096_v55 = vpop.f32.mrf.mxu0 }
 0x193   :  { %v1215_v5 = vadd.f32 %v2096_v55, %v1042_v33 }
 0x194   :  { %v1207_v57 = vpop.f32.mrf.mxu0  ;;  %v1294_v59 = vpop.f32.mrf.mxu1 }
 0x195   :  { %v1383_v28 = vadd.f32 %v1294_v59, %v1210_v4 }
 0x196   :  { %v1208_v63 = vpop.f32.mrf.mxu0  ;;  %v1296_v0 = vpop.f32.mrf.mxu1 }
 0x197   :  { %v1384_v36 = vadd.f32 %v1296_v0, %v1211_v18 }
 0x198   :  { %v1298_v7 = vpop.f32.mrf.mxu1  ;;  %v1335_v9 = vpop.f32.mrf.mxu0 }
 0x199   :  { %v1385_v44 = vadd.f32 %v1335_v9, %v1212_v20 }
 0x19a   :  { %v1299_v17 = vpop.f32.mrf.mxu1  ;;  %v1337_v19 = vpop.f32.mrf.mxu0 }
 0x19b   :  { %v1386_v35 = vadd.f32 %v1337_v19, %v1213_v31 }
 0x19c   :  { %v1339_v25 = vpop.f32.mrf.mxu0  ;;  %v1376_v27 = vpop.f32.mrf.mxu1 }
 0x19d   :  { %v1387_v59 = vadd.f32 %v1376_v27, %v1214_v48 }
 0x19e   :  { %v1340_v29 = vpop.f32.mrf.mxu0  ;;  %v1378_v43 = vpop.f32.mrf.mxu1 }
 0x19f   :  { %v1388_v15 = vadd.f32 %v1378_v43, %v1215_v5 }
 0x1a0   :  { %v1380_v8 = vpop.f32.mrf.mxu1  ;;  %v1467_v32 = vpop.f32.mrf.mxu0 }
 0x1a1   :  { %v1556_v49 = vadd.f32 %v1467_v32, %v1383_v28 }
 0x1a2   :  { %v1469_v2 = vpop.f32.mrf.mxu0  ;;  %v1381_v39 = vpop.f32.mrf.mxu1 }
 0x1a3   :  { %v1557_v12 = vadd.f32 %v1469_v2, %v1384_v36  ;;  %v2114_v42 = vadd.f32 %v2109_v30, %v1556_v49 }
 0x1a4   :  { %v1471_v45 = vpop.f32.mrf.mxu0  ;;  %v1508_v24 = vpop.f32.mrf.mxu1 }
 0x1a5   :  { %v2118_v51 = vadd.f32 %v2109_v30, %v1557_v12  ;;  %v1574_v1 = vmul.f32 1.442695, %v2114_v42  ;;  %v1598_v14 = vmul.f32 0.16666667, %v2114_v42  ;;  %v1558_v47 = vadd.f32 %v1508_v24, %v1385_v44 }
 0x1a6   :  { %v1472_v53 = vpop.f32.mrf.mxu0  ;;  %v1510_v57 = vpop.f32.mrf.mxu1  ;;  %vm1592_vm10 = vcmp.gt.f32.partialorder %v2114_v42, -0.01  ;;  %vm1634_vm12 = vcmp.gt.f32.partialorder %v2114_v42, 0.0 }
 0x1a7   :  { %1760 = vpow2.f32 %v1574_v1  ;;  %v1576_v26 = vmul.f32 1.442695, %v2118_v51  ;;  %v1599_v50 = vmul.f32 0.16666667, %v2118_v51  ;;  %v1604_v52 = vadd.f32 0.5, %v1598_v14 }
 0x1a8   :  { %v2126_v61 = vadd.f32 %v2109_v30, %v1558_v47  ;;  %v1559_v63 = vadd.f32 %v1510_v57, %v1386_v35  ;;  %v1549_v0 = vpop.f32.mrf.mxu0  ;;  %v1512_v3 = vpop.f32.mrf.mxu1  ;;  %vm1593_vm11 = vcmp.gt.f32.partialorder %v2118_v51, -0.01  ;;  %vm1635_vm13 = vcmp.gt.f32.partialorder %v2118_v51, 0.0 }
 0x1a9   :  { %1762 = vpow2.f32 %v1576_v26  ;;  %v1560_v38 = vadd.f32 %v1549_v0, %v1387_v59  ;;  %v1605_v17 = vadd.f32 0.5, %v1599_v50  ;;  %v1610_v23 = vmul.f32 %v1604_v52, %v2114_v42 }
 0x1aa   :  { %v1578_v7 = vmul.f32 1.442695, %v2126_v61  ;;  %v1600_v9 = vmul.f32 0.16666667, %v2126_v61  ;;  %v1551_v11 = vpop.f32.mrf.mxu0  ;;  %v1513_v13 = vpop.f32.mrf.mxu1  ;;  %v2132_v19 = vadd.f32 %v2109_v30, %v1559_v63  ;;  %vm1594_vm14 = vcmp.gt.f32.partialorder %v2126_v61, -0.01 }
 0x1ab   :  { %v2135_v21 = vadd.f32 %v2109_v30, %v1560_v38  ;;  %v1561_v25 = vadd.f32 %v1551_v11, %v1388_v15  ;;  %v1611_v4 = vmul.f32 %v1605_v17, %v2118_v51  ;;  %v1616_v16 = vadd.f32 1.0, %v1610_v23 }
 0x1ac   :  { %1764 = vpow2.f32 %v1578_v7  ;;  %v1553_v55 = vpop.f32.mrf.mxu0  ;;  %v1606_v37 = vadd.f32 0.5, %v1600_v9  ;;  %v1580_v54 = vmul.f32 1.442695, %v2132_v19  ;;  %v1601_v27 = vmul.f32 0.16666667, %v2132_v19 }
 0x1ad   :  { %v1582_v40 = vmul.f32 1.442695, %v2135_v21  ;;  %v1602_v6 = vmul.f32 0.16666667, %v2135_v21  ;;  %v2145_v58 = vadd.f32 %v2109_v30, %v1561_v25  ;;  %v1617_v28 = vadd.f32 1.0, %v1611_v4 }
 0x1ae   :  { %v1554_v56 = vpop.f32.mrf.mxu0  ;;  %1766 = vpow2.f32 %v1580_v54  ;;  %v1612_v29 = vmul.f32 %v1606_v37, %v2126_v61  ;;  %v1607_v43 = vadd.f32 0.5, %v1601_v27  ;;  %v1622_v32 = vmul.f32 %v1616_v16, %v2114_v42 }
 0x1af   :  { %1768 = vpow2.f32 %v1582_v40  ;;  %v1608_v18 = vadd.f32 0.5, %v1602_v6  ;;  %v1584_v46 = vmul.f32 1.442695, %v2145_v58  ;;  %v1603_v60 = vmul.f32 0.16666667, %v2145_v58 }
 0x1b0   :  { %v1618_v36 = vadd.f32 1.0, %v1612_v29  ;;  %v1613_v49 = vmul.f32 %v1607_v43, %v2132_v19  ;;  %v1623_v20 = vmul.f32 %v1617_v28, %v2118_v51  ;;  %vm1636_vm15 = vcmp.gt.f32.partialorder %v2126_v61, 0.0 }
 0x1b1   :  { %1770 = vpow2.f32 %v1584_v46  ;;  %v1614_v30 = vmul.f32 %v1608_v18, %v2135_v21  ;;  %v1609_v39 = vadd.f32 0.5, %v1603_v60  ;;  %vm1595_vm0 = vcmp.gt.f32.partialorder %v2132_v19, -0.01 }
 0x1b2   :  { %v1624_v31 = vmul.f32 %v1618_v36, %v2126_v61  ;;  %v1619_v44 = vadd.f32 1.0, %v1613_v49  ;;  %vm1596_vm1 = vcmp.gt.f32.partialorder %v2135_v21, -0.01  ;;  %vm1637_vm2 = vcmp.gt.f32.partialorder %v2132_v19, 0.0 }
 0x1b3   :  { %v1620_v1 = vadd.f32 1.0, %v1614_v30  ;;  %v1615_v33 = vmul.f32 %v1609_v39, %v2145_v58  ;;  %vm1638_vm3 = vcmp.gt.f32.partialorder %v2135_v21, 0.0  ;;  %vm1597_vm4 = vcmp.gt.f32.partialorder %v2145_v58, -0.01 }
 0x1b4   :  { %v1761_v8 = vpop.eup %1760  ;;  %v1625_v50 = vmul.f32 %v1619_v44, %v2132_v19  ;;  %vm1639_vm5 = vcmp.gt.f32.partialorder %v2145_v58, 0.0 }
 0x1b5   :  { %v1737_v34 = vadd.f32 -1.0, %v1761_v8  ;;  %v1626_v63 = vmul.f32 %v1620_v1, %v2135_v21  ;;  %v1621_v3 = vadd.f32 1.0, %v1615_v33 }
 0x1b6   :  { %v1763_v62 = vpop.eup %1762 }
 0x1b7   :  { %v1738_v10 = vadd.f32 -1.0, %v1763_v62  ;;  %v1628_v2 = vsel %vm1592_vm10, %v1622_v32, %v1737_v34  ;;  %v1627_v23 = vmul.f32 %v1621_v3, %v2145_v58 }
 0x1b8   :  { %v1640_v41 = vmul.f32 1.6732632, %v1628_v2 }
 0x1b9   :  { %v1765_v12 = vpop.eup %1764  ;;  %v1629_v22 = vsel %vm1593_vm11, %v1623_v20, %v1738_v10 }
 0x1ba   :  { %v1641_v45 = vmul.f32 1.6732632, %v1629_v22  ;;  %v1646_v24 = vsel %vm1634_vm12, %v2114_v42, %v1640_v41  ;;  %v1739_v48 = vadd.f32 -1.0, %v1765_v12 }
 0x1bb   :  { %v1652_v14 = vmul.f32 1.050701, %v1646_v24  ;;  %v1767_v35 = vpop.eup %1766 }
 0x1bc   :  { %v1647_v47 = vsel %vm1635_vm13, %v2118_v51, %v1641_v45  ;;  %v1630_v53 = vsel %vm1594_vm14, %v1624_v31, %v1739_v48  ;;  %v1769_v57 = vpop.eup %1768  ;;  %v1740_v26 = vadd.f32 -1.0, %v1767_v35 }
 0x1bd   :  { %v1653_v59 = vmul.f32 1.050701, %v1647_v47  ;;  %1658 = vst [vmem:[%s2197_s3] sm:$0xff] %v1652_v14  ;;  %v1642_v42 = vmul.f32 1.6732632, %v1630_v53  ;;  %v1741_v52 = vadd.f32 -1.0, %v1769_v57 }
 0x1be   :  { %v1631_v0 = vsel %vm1595_vm0, %v1625_v50, %v1740_v26  ;;  %v1771_v11 = vpop.eup %1770 }
 0x1bf   :  { %1659 = vst [vmem:[%s2197_s3 + $0x8] sm:$0xff] %v1653_v59  ;;  %v1648_v51 = vsel %vm1636_vm15, %v2126_v61, %v1642_v42  ;;  %v1643_v38 = vmul.f32 1.6732632, %v1631_v0  ;;  %v1632_v7 = vsel %vm1596_vm1, %v1626_v63, %v1741_v52  ;;  %v1742_v17 = vadd.f32 -1.0, %v1771_v11 }
 0x1c0   :  { %v1654_v5 = vmul.f32 1.050701, %v1648_v51  ;;  %v1644_v9 = vmul.f32 1.6732632, %v1632_v7 }
 0x1c1   :  { %v1649_v13 = vsel %vm1637_vm2, %v2132_v19, %v1643_v38  ;;  %v1633_v37 = vsel %vm1597_vm4, %v1627_v23, %v1742_v17 }
 0x1c2   :  { %1660 = vst [vmem:[%s2197_s3 + $0x10] sm:$0xff] %v1654_v5  ;;  %v1655_v61 = vmul.f32 1.050701, %v1649_v13  ;;  %v1650_v15 = vsel %vm1638_vm3, %v2135_v21, %v1644_v9  ;;  %v1645_v19 = vmul.f32 1.6732632, %v1633_v37 }
 0x1c3   :  { %v1656_v55 = vmul.f32 1.050701, %v1650_v15 }
 0x1c4   :  { %1661 = vst [vmem:[%s2197_s3 + $0x18] sm:$0xff] %v1655_v61  ;;  %v1651_v21 = vsel %vm1639_vm5, %v2145_v58, %v1645_v19 }
 0x1c5   :  { %1662 = vst [vmem:[%s2197_s3 + $0x20] sm:$0xff] %v1656_v55  ;;  %v1657_v54 = vmul.f32 1.050701, %v1651_v21 }
 0x1c7   :  { %1663 = vst [vmem:[%s2197_s3 + $0x28] sm:$0xff] %v1657_v54 }

</bundles_post_ra>
